<compile_context>
chip_gen: v6e
topology: v6e:2x2x1
jax: 0.10.0
libtpu: 0.0.40
codegen_flags: <defaults>
</compile_context>

<pallas_src>
import functools

import jax
import jax.numpy as jnp
from jax import lax
from jax.experimental import pallas as pl
from jax.experimental.pallas import tpu as pltpu

LANE = 128      # TPU lane width; feature dim padded to this.
SUBLANE = 8     # f32 sublane count; batch tile is a multiple of this.


def _maxpool_kernel(idx_ref,            # SMEM scalar-prefetch: (Bp*S,) int32
                    table_ref,          # VMEM: (Vp, Dp) resident embedding table
                    w1_ref, b1_ref,     # VMEM: (Dp, Dp), (1, Dp)
                    w2_ref, b2_ref,     # VMEM: (Dp, Dp), (1, Dp)
                    o_ref,              # VMEM: (TB, Dp) output tile
                    acc_ref,            # VMEM scratch: (TB, Dp) pooled maxima
                    *, seq_len):
    b = pl.program_id(0)
    TB, Dp = acc_ref.shape

    # --- gather + running max over the sequence, one batch row at a time ---
    def row_body(r, carry):
        base = (b * TB + r) * seq_len

        def s_body(s, m):
            i = idx_ref[base + s]                      # SMEM scalar read
            row = table_ref[pl.ds(i, 1), :]            # (1, Dp) VMEM gather
            return jnp.maximum(m, row)

        m0 = jnp.full((1, Dp), -jnp.inf, dtype=jnp.float32)
        m = lax.fori_loop(0, seq_len, s_body, m0)
        acc_ref[pl.ds(r, 1), :] = m
        return carry

    lax.fori_loop(0, TB, row_body, 0)

    # --- batched MLP epilogue on the whole (TB, Dp) tile ---
    # dropout1 / dropout2: rate 0.0 => identity in this forward pass.
    pooled = acc_ref[...]                                                # (TB, Dp)
    h = jnp.dot(pooled, w1_ref[...], preferred_element_type=jnp.float32)
    h = jnp.tanh(h + b1_ref[...])                                        # (TB, Dp)
    o = jnp.dot(h, w2_ref[...], preferred_element_type=jnp.float32)
    o = jnp.tanh(o + b2_ref[...])                                        # (TB, Dp)
    o_ref[...] = o.astype(o_ref.dtype)


def prepare_params(emb_table, w1, b1, w2, b2):
    """One-time padding / transposition of parameters (hoisted out of the hot path).

    w1/w2 are in PyTorch layout (out, in); biases are (out,).
    """
    V, D = emb_table.shape
    Dp = pl.cdiv(D, LANE) * LANE
    Vp = pl.cdiv(V, SUBLANE) * SUBLANE

    emb_p = jnp.zeros((Vp, Dp), jnp.float32).at[:V, :D].set(emb_table.astype(jnp.float32))
    w1_p = jnp.zeros((Dp, Dp), jnp.float32).at[:D, :D].set(w1.T.astype(jnp.float32))
    b1_p = jnp.zeros((1, Dp), jnp.float32).at[0, :D].set(b1.astype(jnp.float32))
    w2_p = jnp.zeros((Dp, Dp), jnp.float32).at[:D, :D].set(w2.T.astype(jnp.float32))
    b2_p = jnp.zeros((1, Dp), jnp.float32).at[0, :D].set(b2.astype(jnp.float32))

    return {"emb": emb_p, "w1": w1_p, "b1": b1_p, "w2": w2_p, "b2": b2_p,
            "vocab": V, "emb_dim": D}


def maxpool_forward(x, params, *, batch_tile=SUBLANE):
    """x: (B, S) integer indices. Returns (B, emb_dim) float32."""
    B, S = x.shape
    Vp, Dp = params["emb"].shape
    V = params["vocab"]
    D = params["emb_dim"]

    TB = batch_tile
    nb = pl.cdiv(B, TB)
    Bp = nb * TB

    # Clamp indices (PyTorch would raise on OOB; we clamp so no bad gather can
    # happen), flatten, and pad extra batch rows with index 0 (zero row).
    idx = jnp.clip(x.astype(jnp.int32), 0, V - 1).reshape(-1)
    idx_flat = jnp.zeros((Bp * S,), jnp.int32).at[: B * S].set(idx)

    grid_spec = pltpu.PrefetchScalarGridSpec(
        num_scalar_prefetch=1,
        grid=(nb,),
        in_specs=[
            # Embedding table: constant block index -> stays resident in VMEM.
            pl.BlockSpec((Vp, Dp), lambda b, idx_ref: (0, 0)),
            # MLP weights/biases: constant block index -> resident in VMEM.
            pl.BlockSpec((Dp, Dp), lambda b, idx_ref: (0, 0)),
            pl.BlockSpec((1, Dp), lambda b, idx_ref: (0, 0)),
            pl.BlockSpec((Dp, Dp), lambda b, idx_ref: (0, 0)),
            pl.BlockSpec((1, Dp), lambda b, idx_ref: (0, 0)),
        ],
        out_specs=pl.BlockSpec((TB, Dp), lambda b, idx_ref: (b, 0)),
        scratch_shapes=[pltpu.VMEM((TB, Dp), jnp.float32)],
    )

    cost = pl.CostEstimate(
        flops=int(2 * 2 * Bp * Dp * Dp),                # two (TB,Dp)@(Dp,Dp) matmuls per tile
        transcendentals=int(2 * Bp * Dp),               # two tanh layers
        bytes_accessed=int(4 * (Bp * S * Dp            # row gathers
                                + Vp * Dp               # table
                                + 2 * Dp * Dp + 2 * Dp  # weights / biases
                                + Bp * Dp)              # output
                           + 4 * Bp * S),               # indices
    )

    out_p = pl.pallas_call(
        functools.partial(_maxpool_kernel, seq_len=S),
        out_shape=jax.ShapeDtypeStruct((Bp, Dp), jnp.float32),
        grid_spec=grid_spec,
        compiler_params=pltpu.CompilerParams(dimension_semantics=("parallel",)),
        cost_estimate=cost,
    )(idx_flat, params["emb"], params["w1"], params["b1"], params["w2"], params["b2"])

    return out_p[:B, :D]


def _reference_forward(x, emb_table, w1, b1, w2, b2):
    e = jnp.take(emb_table, x, axis=0)            # (B, S, D)
    pooled = jnp.max(e, axis=1)                   # (B, D)
    h = jnp.tanh(pooled @ w1.T + b1)
    return jnp.tanh(h @ w2.T + b2)


if __name__ == "__main__":
    # Small synthetic "rec" config: items_num=64, emb_dim=32, max_emb_norm=1.0
    B, S, V, D = 16, 8, 64, 32
    MAX_NORM = 1.0

    key = jax.random.PRNGKey(0)
    k_emb, k_w1, k_b1, k_w2, k_b2, k_x = jax.random.split(key, 6)

    # Embedding table: padding_idx=0 -> row 0 is zero; apply max_norm renorm
    # (lookup-time renorm is equivalent to whole-table renorm for this forward).
    emb_table = jax.random.normal(k_emb, (V, D), dtype=jnp.float32)
    norms = jnp.linalg.norm(emb_table, axis=1, keepdims=True)
    emb_table = emb_table * jnp.minimum(1.0, MAX_NORM / jnp.maximum(norms, 1e-7))
    emb_table = emb_table.at[0].set(0.0)

    # Linear layers (PyTorch layout: weight (out, in), bias (out,))
    lim = 1.0 / jnp.sqrt(D)
    w1 = jax.random.uniform(k_w1, (D, D), jnp.float32, -lim, lim)
    b1 = jax.random.uniform(k_b1, (D,), jnp.float32, -lim, lim)
    w2 = jax.random.uniform(k_w2, (D, D), jnp.float32, -lim, lim)
    b2 = jax.random.uniform(k_b2, (D,), jnp.float32, -lim, lim)

    # Input indices (include a padding 0 to exercise padding_idx semantics).
    x = jax.random.randint(k_x, (B, S), 0, V, dtype=jnp.int32)
    x = x.at[0, 0].set(0)

    params = prepare_params(emb_table, w1, b1, w2, b2)   # one-time padding
    out = maxpool_forward(x, params)
    out = jax.block_until_ready(out)

    ref = _reference_forward(x, emb_table, w1, b1, w2, b2)
    assert out.shape == (B, D)
    assert jnp.allclose(out, ref, atol=1e-5, rtol=1e-5), "mismatch vs reference"

    print("KERNEL_OK")
</pallas_src>

<mosaic_0001>
module attributes {stable_mosaic.version = 11 : i64} {
  func.func @_maxpool_kernel(%arg0: i32, %arg1: memref<128xi32, #tpu.memory_space<smem>>, %arg2: memref<64x128xf32, #tpu.memory_space<vmem>>, %arg3: memref<128x128xf32, #tpu.memory_space<vmem>>, %arg4: memref<1x128xf32, #tpu.memory_space<vmem>>, %arg5: memref<128x128xf32, #tpu.memory_space<vmem>>, %arg6: memref<1x128xf32, #tpu.memory_space<vmem>>, %arg7: memref<8x128xf32, #tpu.memory_space<vmem>>, %arg8: memref<8x128xf32, #tpu.memory_space<vmem>>) attributes {dimension_semantics = [#tpu.dimension_semantics<parallel>], iteration_bounds = array<i64: 2>, scalar_prefetch = 1 : i64, scratch_operands = 1 : i64, tpu.core_type = #tpu.core_type<tc>, window_params = [{pipeline_mode = #tpu.pipeline_mode<synchronous>, transform_indices = @transform_0, window_bounds = array<i64: 64, 128>}, {pipeline_mode = #tpu.pipeline_mode<synchronous>, transform_indices = @transform_1, window_bounds = array<i64: 128, 128>}, {pipeline_mode = #tpu.pipeline_mode<synchronous>, transform_indices = @transform_2, window_bounds = array<i64: 1, 128>}, {pipeline_mode = #tpu.pipeline_mode<synchronous>, transform_indices = @transform_3, window_bounds = array<i64: 128, 128>}, {pipeline_mode = #tpu.pipeline_mode<synchronous>, transform_indices = @transform_4, window_bounds = array<i64: 1, 128>}, {transform_indices = @transform_5, window_bounds = array<i64: 8, 128>}]} {
    %c0_i32 = arith.constant 0 : i32
    %c8_i32 = arith.constant 8 : i32
    %0 = arith.addi %c0_i32, %c8_i32 : i32
    %c1_i32 = arith.constant 1 : i32
    scf.for %arg9 = %c0_i32 to %0 step %c1_i32  : i32 {
      %c8_i32_13 = arith.constant 8 : i32
      %15 = arith.muli %arg0, %c8_i32_13 : i32
      %16 = arith.addi %15, %arg9 : i32
      %c8_i32_14 = arith.constant 8 : i32
      %17 = arith.muli %16, %c8_i32_14 : i32
      %cst_15 = arith.constant 0xFF800000 : f32
      %18 = vector.broadcast %cst_15 : f32 to vector<1x128xf32>
      %c0_i32_16 = arith.constant 0 : i32
      %c8_i32_17 = arith.constant 8 : i32
      %19 = arith.addi %c0_i32_16, %c8_i32_17 : i32
      %c1_i32_18 = arith.constant 1 : i32
      %20 = scf.for %arg10 = %c0_i32_16 to %19 step %c1_i32_18 iter_args(%arg11 = %18) -> (vector<1x128xf32>)  : i32 {
        %23 = arith.addi %17, %arg10 : i32
        %24 = arith.index_cast %23 : i32 to index
        %25 = memref.load %arg1[%24] : memref<128xi32, #tpu.memory_space<smem>>
        %26 = arith.index_cast %25 : i32 to index
        %c0_21 = arith.constant 0 : index
        %27 = vector.load %arg2[%26, %c0_21] : memref<64x128xf32, #tpu.memory_space<vmem>>, vector<1x128xf32>
        %28 = arith.maximumf %arg11, %27 : vector<1x128xf32>
        scf.yield %28 : vector<1x128xf32>
      }
      %c8_i32_19 = arith.constant 8 : i32
      %21 = arith.index_cast %arg9 : i32 to index
      %c0_20 = arith.constant 0 : index
      %22 = vector.load %arg8[%21, %c0_20] : memref<8x128xf32, #tpu.memory_space<vmem>>, vector<1x128xf32>
      tpu.vector_store %arg8[%21, %c0_20], %20 {strides = array<i32>} : memref<8x128xf32, #tpu.memory_space<vmem>>, vector<1x128xf32>,
    }
    %c8_i32_0 = arith.constant 8 : i32
    %c0 = arith.constant 0 : index
    %c0_1 = arith.constant 0 : index
    %1 = vector.load %arg8[%c0, %c0_1] : memref<8x128xf32, #tpu.memory_space<vmem>>, vector<8x128xf32>
    %c0_2 = arith.constant 0 : index
    %c0_3 = arith.constant 0 : index
    %2 = vector.load %arg3[%c0_2, %c0_3] : memref<128x128xf32, #tpu.memory_space<vmem>>, vector<128x128xf32>
    %cst = arith.constant dense<0.000000e+00> : vector<8x128xf32>
    %3 = tpu.matmul %1, %2, %cst {dimension_numbers = #tpu.dot_dimension_numbers<[1], [0], [0], [1], [0, 0, 1, 1], [], []>} : vector<8x128xf32>, vector<128x128xf32>, vector<8x128xf32> -> vector<8x128xf32>
    %c0_4 = arith.constant 0 : index
    %c0_5 = arith.constant 0 : index
    %4 = vector.load %arg4[%c0_4, %c0_5] : memref<1x128xf32, #tpu.memory_space<vmem>>, vector<1x128xf32>
    %5 = vector.broadcast %4 : vector<1x128xf32> to vector<8x128xf32>
    %6 = arith.addf %3, %5 : vector<8x128xf32>
    %7 = math.tanh %6 : vector<8x128xf32>
    %c0_6 = arith.constant 0 : index
    %c0_7 = arith.constant 0 : index
    %8 = vector.load %arg5[%c0_6, %c0_7] : memref<128x128xf32, #tpu.memory_space<vmem>>, vector<128x128xf32>
    %cst_8 = arith.constant dense<0.000000e+00> : vector<8x128xf32>
    %9 = tpu.matmul %7, %8, %cst_8 {dimension_numbers = #tpu.dot_dimension_numbers<[1], [0], [0], [1], [0, 0, 1, 1], [], []>} : vector<8x128xf32>, vector<128x128xf32>, vector<8x128xf32> -> vector<8x128xf32>
    %c0_9 = arith.constant 0 : index
    %c0_10 = arith.constant 0 : index
    %10 = vector.load %arg6[%c0_9, %c0_10] : memref<1x128xf32, #tpu.memory_space<vmem>>, vector<1x128xf32>
    %11 = vector.broadcast %10 : vector<1x128xf32> to vector<8x128xf32>
    %12 = arith.addf %9, %11 : vector<8x128xf32>
    %13 = math.tanh %12 : vector<8x128xf32>
    %c0_11 = arith.constant 0 : index
    %c0_12 = arith.constant 0 : index
    %14 = vector.load %arg7[%c0_11, %c0_12] : memref<8x128xf32, #tpu.memory_space<vmem>>, vector<8x128xf32>
    tpu.vector_store %arg7[%c0_11, %c0_12], %13 {strides = array<i32>} : memref<8x128xf32, #tpu.memory_space<vmem>>, vector<8x128xf32>,
    return
  }
  func.func @transform_0(%arg0: i32, %arg1: memref<128xi32, #tpu.memory_space<smem>>) -> (i32, i32) {
    %c0_i32 = arith.constant 0 : i32
    %c0_i32_0 = arith.constant 0 : i32
    %c0_i32_1 = arith.constant 0 : i32
    return %c0_i32, %c0_i32_0 : i32, i32
  }
  func.func @transform_1(%arg0: i32, %arg1: memref<128xi32, #tpu.memory_space<smem>>) -> (i32, i32) {
    %c0_i32 = arith.constant 0 : i32
    %c0_i32_0 = arith.constant 0 : i32
    %c0_i32_1 = arith.constant 0 : i32
    return %c0_i32, %c0_i32_0 : i32, i32
  }
  func.func @transform_2(%arg0: i32, %arg1: memref<128xi32, #tpu.memory_space<smem>>) -> (i32, i32) {
    %c0_i32 = arith.constant 0 : i32
    %c0_i32_0 = arith.constant 0 : i32
    %c0_i32_1 = arith.constant 0 : i32
    return %c0_i32, %c0_i32_0 : i32, i32
  }
  func.func @transform_3(%arg0: i32, %arg1: memref<128xi32, #tpu.memory_space<smem>>) -> (i32, i32) {
    %c0_i32 = arith.constant 0 : i32
    %c0_i32_0 = arith.constant 0 : i32
    %c0_i32_1 = arith.constant 0 : i32
    return %c0_i32, %c0_i32_0 : i32, i32
  }
  func.func @transform_4(%arg0: i32, %arg1: memref<128xi32, #tpu.memory_space<smem>>) -> (i32, i32) {
    %c0_i32 = arith.constant 0 : i32
    %c0_i32_0 = arith.constant 0 : i32
    %c0_i32_1 = arith.constant 0 : i32
    return %c0_i32, %c0_i32_0 : i32, i32
  }
  func.func @transform_5(%arg0: i32, %arg1: memref<128xi32, #tpu.memory_space<smem>>) -> (i32, i32) {
    %c0_i32 = arith.constant 0 : i32
    %c0_i32_0 = arith.constant 0 : i32
    return %arg0, %c0_i32 : i32, i32
  }
}

</mosaic_0001>

<bundles_post_ra>
// kernel: tpu_custom_call.1
= control target key start
LH: loop header
LB: loop body
LE: loop exit
PB: predicated region body
PF: predicated region fallthrough
CT: control target
= control target key end

     0   :  { %s979_s21 = smov [#allocation4]   ;;  %s1215_s0 = inlined_call_operand.hbm [shape: s32[128], index: 0, kind: input, shape index: {}]   ;;  %s1216_s1 = inlined_call_operand.hbm [shape: f32[64,128], index: 1, kind: input, shape index: {}]   ;;  %s1217_s2 = inlined_call_operand.hbm [shape: f32[128,128], index: 2, kind: input, shape index: {}]   ;;  %s1218_s3 = inlined_call_operand.vmem [shape: f32[1,128], index: 3, kind: input, shape index: {}]   ;;  %s1219_s4 = inlined_call_operand.hbm [shape: f32[128,128], index: 4, kind: input, shape index: {}]   ;;  %s1220_s5 = inlined_call_operand.vmem [shape: f32[1,128], index: 5, kind: input, shape index: {}]   ;;  %s1221_s6 = inlined_call_operand.hbm [shape: f32[16,128], index: 6, kind: output, shape index: {}]  }
   0x1   :  { %12 = dma.hbm_to_smem %s1215_s0, 16, %s979_s21, [#allocation3] }
   0x2   :  { %937 = dma.done.wait [#allocation3], 16 }
   0x3   :  { %938 = vsyncadd [#allocation3], 4294967280 }
   0x4   :  { %14 = sfence }
   0x5   :  { %15 = vsyncpa [#allocation6], 0 }
   0x6   :  { %16 = vsyncpa [#allocation9], 0 }
   0x7   :  { %17 = vsyncpa [#allocation7], 0 }
   0x8   :  { %19 = vsyncpa [#allocation7 + $0x1], 0  ;;  %s1026_s24 = smov 0   ;;  %s1028_s25 = smov 0  }
   0x9   :  { %s1030_s26 = smov 0   ;;  %s1032_s27 = smov 0  }
   0xa LB: > { %s1047_s0 = sadd.s32 4294967295, %s965_s27   ;;  %s572_s28 = sadd.s32 4294967294, %s965_s27   ;;  %s965_s27 = sphi %s1032_s27, %s1237_s27   ;;  %s961_s26 = sphi %s1030_s26, %s1236_s26   ;;  %s957_s25 = sphi %s1028_s25, %s1235_s25   ;;  %s953_s24 = sphi %s1026_s24, %s1234_s24  }
   0xb   : > { %s1051_s29 = sadd.s32 1, %s965_s27   ;;  %s137_s30 = sadd.s32 1, %s961_s26 }
   0xc   : > { %s134_s7 = ssub.s32 %s965_s27, %s1051_s29  ;;  %p147_p0 = scmp.ne.s32.totalorder %s961_s26, %s957_s25 }
   0xd   : > { %p135_p1 = scmp.eq.s32.totalorder %s134_s7, 0  ;;  %p148_p2 = scmp.eq.s32.totalorder %s1047_s0, 1 }
   0xe   : > { %p153_p3 = scmp.ne.s32.totalorder %s957_s25, %s953_s24  ;;  %p154_p4 = scmp.eq.s32.totalorder %s572_s28, 1 }
   0xf   : > { %s1062_s8 = scalar_select %p135_p1, %s961_s26, %s137_s30  }
  0x10   : > { %p1064_p5 = por %p148_p2, %p147_p0  ;;  %p1068_p6 = por %p154_p4, %p153_p3 }
  0x11   : > { %p573_p7 = scmp.ge.s32.totalorder %s965_s27, 1  ;;  %p161_p8 = scmp.lt.s32.totalorder %s965_s27, 3 }
  0x12   : > { %s1224_s9 = scalar_select %p1064_p5, 1, 0 }
  0x13   : > { %s1225_s10 = scalar_select %p1068_p6, 1, 0 }
  0x14   : > { %p1222_p9 = scmp.eq.s32.totalorder %s1047_s0, 0  ;;  %p1075_p10 = pnand %p573_p7, %p161_p8 }
  0x15   : > { %s980_s12 = smov [#allocation8]   ;;  %s981_s15 = smov [#allocation5]  }
  0x16   : > { %p708_p11 = pneg %p1075_p10  ;;  %s186_s13 = sshll.u32 %s980_s12, 4  ;;  %s187_s13 = int_to_ptr.vmem [resolvable:$true] %s186_s13 }
  0x17   : > { %s173_s16 = sshll.u32 %s981_s15, 4  ;;  %s982_s17 = smov [#allocation10]   ;;  %s174_s16 = int_to_ptr.vmem [resolvable:$true] %s173_s16 }
  0x18   : > { %p1083_p12 = pnand %p1222_p9, %p708_p11  ;;  %s202_s18 = sshll.u32 %s982_s17, 4  ;;  %s203_s18 = int_to_ptr.vmem [resolvable:$true] %s202_s18 }
  0x19   : > { %s816_s19 = scalar_lea.vmem %s187_s13, 2048  ;;  %p824_p3 = scmp.lt.s32.totalorder %s187_s13, %s187_s13 }
  0x1a   : > { %p807_p13 = pneg %p1083_p12  ;;  %p817_p0 = scmp.ne.s32.totalorder %s187_s13, %s816_s19 }
  0x1b   : > { %p825_p4 = scmp.lt.s32.totalorder %s816_s19, %s816_s19 }
  0x1c   : > { %p819_p1 = pnand %p817_p0, %p807_p13 }
  0x1d   : > { %p826_p7 = por %p825_p4, %p824_p3 }
  0x1e   : > { %p820_p2 = pneg %p819_p1 }
  0x20   : > { %p827_p8 = pnand %p826_p7, %p820_p2 }
  0x22   : > { %830 = shalt.err (!%p827_p8)
}
  0x23   : > { %s983_s20 = smov 128   ;;  %s984_s21 = smov 8  }
  0x24   : > { %714 = dma.hbm_to_vmem [thread:$0]  (!%p1083_p12), %s1217_s2, 2048, %s187_s13, [#allocation9], %s983_s20, %s983_s20, %s984_s21  }
  0x25   : > { %s842_s28 = scalar_lea.vmem %s174_s16, 1024  ;;  %p850_p9 = scmp.lt.s32.totalorder %s174_s16, %s174_s16 }
  0x26   : > { %p843_p11 = scmp.ne.s32.totalorder %s174_s16, %s842_s28  ;;  %p851_p6 = scmp.lt.s32.totalorder %s842_s28, %s842_s28 }
  0x28   : > { %p845_p0 = pnand %p843_p11, %p807_p13  ;;  %p852_p3 = por %p851_p6, %p850_p9 }
  0x2a   : > { %p846_p1 = pneg %p845_p0 }
  0x2c   : > { %p853_p2 = pnand %p852_p3, %p846_p1 }
  0x2e   : > { %856 = shalt.err (!%p853_p2)
}
  0x2f   : > { %711 = dma.hbm_to_vmem [thread:$0]  (!%p1083_p12), %s1216_s1, 1024, %s174_s16, [#allocation6], %s983_s20, %s983_s20, %s984_s21  }
  0x30   : > { %s868_s12 = scalar_lea.vmem %s203_s18, 2048  ;;  %p876_p11 = scmp.lt.s32.totalorder %s203_s18, %s203_s18 }
  0x31   : > { %p869_p4 = scmp.ne.s32.totalorder %s203_s18, %s868_s12  ;;  %p877_p0 = scmp.lt.s32.totalorder %s868_s12, %s868_s12 }
  0x33   : > { %p871_p7 = pnand %p869_p4, %p807_p13  ;;  %p878_p5 = por %p877_p0, %p876_p11 }
  0x35   : > { %p872_p8 = pneg %p871_p7 }
  0x37   : > { %p879_p6 = pnand %p878_p5, %p872_p8 }
  0x39   : > { %882 = shalt.err (!%p879_p6)
}
  0x3a   : > { %717 = dma.hbm_to_vmem [thread:$0]  (!%p1083_p12), %s1219_s4, 2048, %s203_s18, [#allocation9], %s983_s20, %s983_s20, %s984_s21  }
  0x3b   : > { %221 = sbr.rel (%p1075_p10) target bundleno = 550 (0x226), region = 40  ;;  %p1228_p9 = scmp.eq.s32.totalorder (!%p1075_p10), %s1047_s0, 0 }
  0x40   : > { %940 = dma.done.wait (%p1228_p9), [#allocation6], 1024   ;;  %p1229_p13 = pmov %p1228_p9 }
  0x41   : > { %p1230_p1 = pmov %p1228_p9 }
  0x42   : > { %942 = vsyncadd (%p1229_p13), [#allocation6], 4294966272 }
  0x43   : > { %944 = dma.done.wait (%p1230_p1), [#allocation9], 4096   ;;  %p1231_p5 = pmov %p1230_p1 }
  0x44   : > { %s249_s14 = sand.u32 1, %s957_s25   ;;  %s967_s17 = smov 0  }
  0x45   : > { %946 = vsyncadd (%p1231_p5), [#allocation9], 4294963200  ;;  %s1126_s16 = sshll.u32 %s249_s14, 3 }
  0x46   : > { %s251_s11 = scalar_lea.vmem [#allocation11], %s1126_s16 }
  0x47 LB: >> { %s582_s18 = sshll.u32 %s1047_s0, 3  ;;  %v971_v0 = vmov -inf   ;;  %s975_s21 = smov 0   ;;  %s969_s17 = sphi %s967_s17, %s257_s17  }
  0x48   : >> { %s259_s19 = sadd.s32 %s969_s17, %s582_s18 }
  0x49   : >> { %s583_s20 = sshll.u32 %s259_s19, 3 }
  0x4a LB: >>> { %s268_s22 = sadd.s32 %s977_s21, %s583_s20  ;;  %s266_s21 = sadd.s32 1, %s977_s21   ;;  %s977_s21 = sphi %s975_s21, %s266_s21   ;;  %v973_v0 = vphi %v971_v0, %v972_v0  }
  0x4b   : >>> { %s269_s23 = sld [smem:[#allocation4 + %s268_s22]]  ;;  %p263_p10 = scmp.ge.s32.totalorder %s266_s21, 8  }
  0x4c   : >> { %s273_s30 = scalar_lea.vmem (%p263_p10), [#allocation2], %s969_s17  ;;  %s257_s17 = sadd.s32 (%p263_p10), 1, %s969_s17  }
  0x4d   : >> { %p254_p12 = scmp.ge.s32.totalorder (%p263_p10), %s257_s17, 8  }
  0x51   : >>> { %s270_s28 = scalar_lea.vmem [#allocation5], %s269_s23  ;;  %265 = sbr.rel (!%p263_p10) target bundleno = 74 (0x4a), region = 101 }
  0x52   : >>> { %v271_v1 = vld [vmem:[%s270_s28] sm:$0x1] }
  0x53   : >>> { %v272_v2 = vmax.f32 %v973_v0, %v271_v1  }
  0x55   : >>> { %v972_v0 = vmov %v272_v2   ;;  %274 = vst [vmem:[%s273_s30] sm:$0x1] (%p263_p10), %v272_v2 }
  0x56   : > { %256 = sbr.rel (!%p254_p12) target bundleno = 71 (0x47), region = 112  ;;  %v291_v3 = vld [vmem:[#allocation8 + $0x78] sm:$0xff] (%p254_p12)  ;;  %v985_v4 = vmov (%p254_p12), 0.0   ;;  %v290_v5 = vld [vmem:[#allocation8 + $0x70] sm:$0xff] (%p254_p12)  ;;  %vm986_vm0 = vmmov (%p254_p12), 0   ;;  %v289_v6 = vld [vmem:[#allocation8 + $0x68] sm:$0xff] (%p254_p12) }
  0x57   : > { %624 = vmatprep.subr.mxu0 (%p254_p12), %v985_v4  ;;  %656 = vmatprep.mubr.msk.f32.mxu0 (%p254_p12), %vm986_vm0, %v985_v4  ;;  %v288_v7 = vld [vmem:[#allocation8 + $0x60] sm:$0xff] (%p254_p12)  ;;  %v385_v8 = vld [vmem:[#allocation10 + $0x78] sm:$0xff] (%p254_p12)  ;;  %v384_v9 = vld [vmem:[#allocation10 + $0x70] sm:$0xff] (%p254_p12)  ;;  %s587_s17 = sshll.u32 (%p254_p12), %s1047_s0, 7  ;;  %s479_s18 = sshll.u32 (%p254_p12), %s251_s11, 4  ;;  %s480_s18 = int_to_ptr.vmem [resolvable:$true] %s479_s18 }
  0x58   : > { %625 = vmatpush3.msra.mxu0 (%p254_p12), %v291_v3  ;;  %659 = vmatprep.subr.mxu1 (%p254_p12), %v985_v4  ;;  %v287_v10 = vld [vmem:[#allocation8 + $0x58] sm:$0xff] (%p254_p12)  ;;  %v383_v11 = vld [vmem:[#allocation10 + $0x68] sm:$0xff] (%p254_p12)  ;;  %v286_v12 = vld [vmem:[#allocation8 + $0x50] sm:$0xff] (%p254_p12)  ;;  %s1176_s21 = scalar_lea.hbm (%p254_p12), %s1221_s6, %s587_s17  ;;  %s466_s22 = scalar_lea.sflag (%p254_p12), [#allocation7], %s249_s14 }
  0x59   : > { %626 = vmatprep.subr.mxu0 (%p254_p12), %v985_v4  ;;  %691 = vmatprep.mubr.msk.f32.mxu1 (%p254_p12), %vm986_vm0, %v985_v4  ;;  %v382_v13 = vld [vmem:[#allocation10 + $0x60] sm:$0xff] (%p254_p12)  ;;  %v285_v14 = vld [vmem:[#allocation8 + $0x48] sm:$0xff] (%p254_p12)  ;;  %v381_v15 = vld [vmem:[#allocation10 + $0x58] sm:$0xff] (%p254_p12)  ;;  %s883_s23 = scalar_lea.vmem (%p254_p12), %s480_s18, 128  ;;  %p1232_p2 = scmp.ne.s32.totalorder (%p254_p12), %s1224_s9, 0 }
  0x5a   : > { %627 = vmatpush3.msra.mxu0 (%p254_p12), %v290_v5  ;;  %660 = vmatpush3.msra.mxu1 (%p254_p12), %v385_v8  ;;  %v284_v16 = vld [vmem:[#allocation8 + $0x40] sm:$0xff] (%p254_p12)  ;;  %v380_v17 = vld [vmem:[#allocation10 + $0x50] sm:$0xff] (%p254_p12)  ;;  %v283_v18 = vld [vmem:[#allocation8 + $0x38] sm:$0xff] (%p254_p12)  ;;  %p884_p3 = scmp.ne.s32.totalorder (%p254_p12), %s480_s18, %s883_s23  ;;  %s987_s28 = smov (%p254_p12), [#allocation11]  }
  0x5b   : > { %628 = vmatprep.subr.mxu0 %v985_v4  ;;  %661 = vmatprep.subr.mxu1 %v985_v4  ;;  %v379_v19 = vld [vmem:[#allocation10 + $0x48] sm:$0xff]  ;;  %v282_v20 = vld [vmem:[#allocation8 + $0x30] sm:$0xff]  ;;  %v280_v22 = vld [vmem:[#allocation8 + $0x20] sm:$0xff]  ;;  %s887_s0 = sshll.u32 %s987_s28, 4  ;;  %s888_s0 = int_to_ptr.vmem [resolvable:$false] %s887_s0 }
  0x5c   : > { %629 = vmatpush3.msra.mxu0 %v289_v6  ;;  %662 = vmatpush3.msra.mxu1 %v384_v9  ;;  %v281_v21 = vld [vmem:[#allocation8 + $0x28] sm:$0xff]  ;;  %v279_v23 = vld [vmem:[#allocation8 + $0x18] sm:$0xff]  ;;  %v278_v24 = vld [vmem:[#allocation8 + $0x10] sm:$0xff]  ;;  %p885_p4 = pnand %p884_p3, %p1232_p2  ;;  %s889_s30 = scalar_lea.vmem %s888_s0, 256 }
  0x5d   : > { %630 = vmatprep.subr.mxu0 %v985_v4  ;;  %663 = vmatprep.subr.mxu1 %v985_v4  ;;  %v277_v25 = vld [vmem:[#allocation8 + $0x8] sm:$0xff]  ;;  %v276_v26 = vld [vmem:[#allocation8] sm:$0xff]  ;;  %v275_v27 = vld [vmem:[#allocation2] sm:$0xff]  ;;  %p890_p8 = scmp.lt.s32.totalorder %s480_s18, %s888_s0  ;;  %p891_p11 = scmp.lt.s32.totalorder %s889_s30, %s883_s23 }
  0x5e   : > { %631 = vmatpush3.msra.mxu0 %v288_v7  ;;  %664 = vmatpush3.msra.mxu1 %v383_v11  ;;  %v378_v28 = vld [vmem:[#allocation10 + $0x40] sm:$0xff]  ;;  %v377_v29 = vld [vmem:[#allocation10 + $0x38] sm:$0xff]  ;;  %v376_v30 = vld [vmem:[#allocation10 + $0x30] sm:$0xff]  ;;  %p886_p7 = pneg %p885_p4 }
  0x5f   : > { %632 = vmatprep.subr.mxu0 %v985_v4  ;;  %665 = vmatprep.subr.mxu1 %v985_v4  ;;  %v375_v31 = vld [vmem:[#allocation10 + $0x28] sm:$0xff]  ;;  %v374_v32 = vld [vmem:[#allocation10 + $0x20] sm:$0xff]  ;;  %v373_v33 = vld [vmem:[#allocation10 + $0x18] sm:$0xff]  ;;  %p892_p0 = por %p891_p11, %p890_p8 }
  0x60   : > { %633 = vmatpush3.msra.mxu0 %v287_v10  ;;  %666 = vmatpush3.msra.mxu1 %v382_v13  ;;  %v372_v34 = vld [vmem:[#allocation10 + $0x10] sm:$0xff]  ;;  %v371_v35 = vld [vmem:[#allocation10 + $0x8] sm:$0xff]  ;;  %v370_v36 = vld [vmem:[#allocation10] sm:$0xff] }
  0x61   : > { %634 = vmatprep.subr.mxu0 %v985_v4  ;;  %667 = vmatprep.subr.mxu1 %v985_v4  ;;  %v584_v37 = vld [vmem:[%s1218_s3] ss:$0 sm:$0xff]  ;;  %p893_p6 = pnand %p892_p0, %p886_p7 }
  0x62   : > { %635 = vmatpush3.msra.mxu0 %v286_v12  ;;  %668 = vmatpush3.msra.mxu1 %v381_v15  ;;  %v585_v42 = vld [vmem:[%s1220_s5] ss:$0 sm:$0xff] }
  0x63   : > { %636 = vmatprep.subr.mxu0 %v985_v4  ;;  %669 = vmatprep.subr.mxu1 %v985_v4 }
  0x64   : > { %637 = vmatpush3.msra.mxu0 %v285_v14  ;;  %670 = vmatpush3.msra.mxu1 %v380_v17 }
  0x65   : > { %638 = vmatprep.subr.mxu0 %v985_v4  ;;  %671 = vmatprep.subr.mxu1 %v985_v4 }
  0x66   : > { %639 = vmatpush3.msra.mxu0 %v284_v16  ;;  %672 = vmatpush3.msra.mxu1 %v379_v19 }
  0x67   : > { %640 = vmatprep.subr.mxu0 %v985_v4  ;;  %673 = vmatprep.subr.mxu1 %v985_v4 }
  0x68   : > { %641 = vmatpush3.msra.mxu0 %v283_v18  ;;  %674 = vmatpush3.msra.mxu1 %v378_v28 }
  0x69   : > { %642 = vmatprep.subr.mxu0 %v985_v4  ;;  %675 = vmatprep.subr.mxu1 %v985_v4 }
  0x6a   : > { %643 = vmatpush3.msra.mxu0 %v282_v20  ;;  %676 = vmatpush3.msra.mxu1 %v377_v29 }
  0x6b   : > { %644 = vmatprep.subr.mxu0 %v985_v4  ;;  %677 = vmatprep.subr.mxu1 %v985_v4 }
  0x6c   : > { %645 = vmatpush3.msra.mxu0 %v281_v21  ;;  %678 = vmatpush3.msra.mxu1 %v376_v30 }
  0x6d   : > { %646 = vmatprep.subr.mxu0 %v985_v4  ;;  %679 = vmatprep.subr.mxu1 %v985_v4 }
  0x6e   : > { %647 = vmatpush3.msra.mxu0 %v280_v22  ;;  %680 = vmatpush3.msra.mxu1 %v375_v31 }
  0x6f   : > { %648 = vmatprep.subr.mxu0 %v985_v4  ;;  %681 = vmatprep.subr.mxu1 %v985_v4 }
  0x70   : > { %649 = vmatpush3.msra.mxu0 %v279_v23  ;;  %682 = vmatpush3.msra.mxu1 %v374_v32 }
  0x71   : > { %650 = vmatprep.subr.mxu0 %v985_v4  ;;  %683 = vmatprep.subr.mxu1 %v985_v4 }
  0x72   : > { %651 = vmatpush3.msra.mxu0 %v278_v24  ;;  %684 = vmatpush3.msra.mxu1 %v373_v33 }
  0x73   : > { %652 = vmatprep.subr.mxu0 %v985_v4  ;;  %685 = vmatprep.subr.mxu1 %v985_v4 }
  0x74   : > { %653 = vmatpush3.msra.mxu0 %v277_v25  ;;  %686 = vmatpush3.msra.mxu1 %v372_v34 }
  0x75   : > { %654 = vmatprep.subr.mxu0 %v985_v4  ;;  %687 = vmatprep.subr.mxu1 %v985_v4 }
  0x76   : > { %655 = vmatpush3.msra.mxu0 %v276_v26  ;;  %688 = vmatpush3.msra.mxu1 %v371_v35 }
  0x77   : > { %657 = vmatmul.mubr.f32.vlgmr.msra.gmra.mxu0 %v275_v27  ;;  %689 = vmatprep.subr.mxu1 %v985_v4 }
  0x78   : > { %690 = vmatpush3.msra.mxu1 %v370_v36 }
 0x137   : > { %v365_v38 = vpop.f32.mrf.mxu0 }
 0x138   : > { %v366_v39 = vadd.f32 %v584_v37, %v365_v38 }
 0x139   : > { %v658_v40 = vpop.f32.mrf.mxu0 }
 0x13a   : > { %793 = vtanh.f32 %v366_v39 }
 0x147   : > { %v794_v41 = vpop.eup %793 }
 0x148   : > { %692 = vmatmul.mubr.f32.vlgmr.msra.gmra.mxu1 %v794_v41 }
 0x208   : > { %v459_v43 = vpop.f32.mrf.mxu1 }
 0x209   : > { %v460_v44 = vadd.f32 %v585_v42, %v459_v43 }
 0x20a   : > { %v693_v45 = vpop.f32.mrf.mxu1 }
 0x20b   : > { %795 = vtanh.f32 %v460_v44 }
 0x218   : > { %v796_v46 = vpop.eup %795 }
 0x219   : > { %464 = vst [vmem:[%s251_s11] sm:$0xff] %v796_v46 }
 0x21a   : > { %896 = shalt.err (!%p893_p6)
}
 0x21b   : > { %s897_s16 = scalar_lea.hbm %s1176_s21, 128  ;;  %s901_s7 = scalar_lea.hbm %s1221_s6, 256 }
 0x21c   : > { %p898_p9 = scmp.ne.s32.totalorder %s1176_s21, %s897_s16  ;;  %p902_p5 = scmp.lt.s32.totalorder %s1176_s21, %s1221_s6 }
 0x21d   : > { %p903_p10 = scmp.lt.s32.totalorder %s901_s7, %s897_s16 }
 0x21e   : > { %p899_p13 = pnand %p898_p9, %p1232_p2 }
 0x21f   : > { %p904_p12 = por %p903_p10, %p902_p5 }
 0x220   : > { %p900_p1 = pneg %p899_p13 }
 0x222   : > { %p905_p3 = pnand %p904_p12, %p900_p1 }
 0x224   : > { %908 = shalt.err (!%p905_p3)
}
 0x225   : > { %706 = dma.vmem_to_hbm [thread:$0]  (%p1232_p2), %s480_s18, 128, %s1176_s21, %s466_s22  }
 0x226 PF: > { %p728_p4 = scmp.ge.s32.totalorder %s965_s27, 2  ;;  %s491_s15 = sand.u32 1, %s953_s24  }
 0x227   : > { %p1233_p7 = scmp.ne.s32.totalorder %s1225_s10, 0  ;;  %s492_s17 = scalar_lea.sflag [#allocation7], %s491_s15 }
 0x229   : > { %p719_p8 = pnand %p728_p4, %p1233_p7 }
 0x22b   : > { %p720_p11 = pneg %p719_p8 }
 0x22d   : > { %948 = dma.done.wait (%p720_p11), %s492_s17, 128  }
 0x22e   : > { %950 = vsyncadd (%p720_p11), %s492_s17, 4294967168  ;;  %p22_p0 = scmp.ge.s32.totalorder %s1051_s29, 4   ;;  %s1234_s24 = smov %s957_s25 }
 0x22f   : > { %s1235_s25 = smov %s961_s26  ;;  %s1236_s26 = smov %s1062_s8 }
 0x230   : > { %s1237_s27 = smov %s1051_s29  ;;  %24 = sbr.rel (!%p22_p0) target bundleno = 10 (0xa), region = 123 }
 0x235   :  { %497 = vsyncpa [#allocation6], 1 }
 0x236   :  { %499 = vsyncpa [#allocation6 + $0x1], 1 }
 0x237   :  { %500 = vsyncpa [#allocation9], 1 }
 0x238   :  { %501 = vsyncpa [#allocation7], 1 }
 0x239   :  { %503 = vsyncpa [#allocation7 + $0x1], 1 }

</bundles_post_ra>
